<compile_context>
chip_gen: v7x
topology: tpu7x:2x2x1
jax: 0.10.0
libtpu: 0.0.40
codegen_flags: <defaults>
</compile_context>

<pallas_src>
import functools

import jax
import jax.numpy as jnp
from jax import lax
from jax.experimental import pallas as pl
from jax.experimental.pallas import tpu as pltpu


K_NEIGHBORS = 8
# v7x-safe: 64 MiB physical per TensorCore -> keep scoped VMEM + tile payload low.
_VMEM_LIMIT = 48 * 1024 * 1024
_TILE_VMEM_BUDGET = 32 * 1024 * 1024


def _pick_row_tile(R, k, cn, cc, cout, out_bytes, budget=_TILE_VMEM_BUDGET):
    """Largest power-of-two row tile (>=16, divides R) fitting the VMEM budget."""
    # double-buffered bf16 inputs + double-buffered output + ~3 live (TR,Cout) f32 temps
    per_row = 2 * (k * cn * 2 + cc * 2 + cout * out_bytes) + 3 * cout * 4
    max_tile = 512 if (max(cn, cc) >= 512 or cout >= 1024) else 2048
    best, t = None, 16
    while t <= min(R, max_tile):
        if R % t == 0 and t * per_row <= budget:
            best = t
        t *= 2
    return best if best is not None else R


def _pick_pairwise_tile(N, budget=_TILE_VMEM_BUDGET):
    """Row tile for the kNN kernel: ~6 live (TN, N) f32 temporaries during top-k."""
    best, t = None, 16
    while t <= min(N, 2048):
        if N % t == 0 and 6 * t * N * 4 <= budget:
            best = t
        t *= 2
    return best if best is not None else N


# ---------------------------------------------------------------------------
# Pallas kernel 1: pairwise affinity + fused streaming top-k (neighbor indices).
# ---------------------------------------------------------------------------
def _knn_kernel(xr_ref, xt_ref, sq_ref, o_ref, *, k):
    xr = xr_ref[0]                                             # (TN, C) bf16 row slab
    xt = xt_ref[0]                                             # (C, N)  bf16 all points^T
    g = jnp.dot(xr, xt, preferred_element_type=jnp.float32)    # (TN, N) f32, bf16 MXU
    xr32 = xr.astype(jnp.float32)
    sq_r = jnp.sum(xr32 * xr32, axis=-1, keepdims=True)        # (TN, 1) f32 row norms
    # affinity = -||xi - xj||^2 = 2 xi.xj - ||xi||^2 - ||xj||^2  (larger == closer)
    scores = 2.0 * g - sq_r - sq_ref[0]                        # sq_ref[0]: (1, N) f32
    tn, n = scores.shape
    col_i = lax.broadcasted_iota(jnp.int32, (tn, n), 1)
    col_f = col_i.astype(jnp.float32)
    kk_ids = lax.broadcasted_iota(jnp.int32, (tn, k), 1)
    out = jnp.zeros((tn, k), jnp.int32)
    neg_inf = jnp.float32(-jnp.inf)
    for kk in range(k):                                        # streaming top-k, unrolled
        m = jnp.max(scores, axis=-1, keepdims=True)            # (TN, 1)
        # lowest tied column index (matches lax.top_k tie-breaking)
        idx_f = jnp.min(jnp.where(scores == m, col_f, jnp.float32(n)),
                        axis=-1, keepdims=True)                # (TN, 1) f32
        out = jnp.where(kk_ids == kk, idx_f.astype(jnp.int32), out)
        scores = jnp.where(col_f == idx_f, neg_inf, scores)    # mask selected column
    o_ref[0] = out                                             # (TN, k) int32


def knn_indices(xf, k=K_NEIGHBORS):
    # xf: (B, N, C) bf16 -> idx: (B, N, k) int32
    B, N, C = xf.shape
    TN = _pick_pairwise_tile(N)
    x32 = xf.astype(jnp.float32)
    sq = jnp.sum(x32 * x32, axis=-1)[:, None, :]               # (B, 1, N) f32 col norms
    xt = jnp.transpose(xf, (0, 2, 1))                          # (B, C, N) one-time transpose
    return pl.pallas_call(
        functools.partial(_knn_kernel, k=k),
        grid=(B, N // TN),
        in_specs=[pl.BlockSpec((1, TN, C), lambda b, r: (b, r, 0)),
                  pl.BlockSpec((1, C, N), lambda b, r: (b, 0, 0)),
                  pl.BlockSpec((1, 1, N), lambda b, r: (b, 0, 0))],
        out_specs=pl.BlockSpec((1, TN, k), lambda b, r: (b, r, 0)),
        out_shape=jax.ShapeDtypeStruct((B, N, k), jnp.int32),
        compiler_params=pltpu.CompilerParams(
            dimension_semantics=("parallel", "parallel"),
            vmem_limit_bytes=_VMEM_LIMIT),
    )(xf, xt, sq)


# ---------------------------------------------------------------------------
# Pallas kernel 2: fused 1x1 conv + BN(eval) + activation + max over neighbors.
# ---------------------------------------------------------------------------
def _edge_conv_kernel(nbr_ref, ctr_ref, wt_ref, wc_ref, scale_ref, shift_ref,
                      o_ref, *, act):
    # nbr_ref: (k, TR, Cn) bf16   ctr_ref: (TR, Cc) bf16
    # wt_ref : (Cn, Cout) bf16    wc_ref : (Cc, Cout) bf16 (both sign-folded)
    k = nbr_ref.shape[0]
    wt = wt_ref[...]
    # Center projection computed ONCE per row (instead of once per neighbor).
    base = jnp.dot(ctr_ref[...], wc_ref[...],
                   preferred_element_type=jnp.float32)          # (TR, Cout) f32
    ymax = jnp.dot(nbr_ref[0], wt, preferred_element_type=jnp.float32)
    for kk in range(1, k):                                      # k = 8, unrolled
        ymax = jnp.maximum(ymax, jnp.dot(nbr_ref[kk], wt,
                                         preferred_element_type=jnp.float32))
    # sign(scale) folded into weight columns by the wrapper -> |scale| here, so a
    # single max accumulator is exact; relu/tanh/identity are monotone, so BN+act
    # hoist out of the k loop exactly.
    y = (ymax + base) * scale_ref[...] + shift_ref[...]
    if act == "relu":
        y = jnp.maximum(y, 0.0)
    elif act == "tanh":
        y = jnp.tanh(y)
    o_ref[...] = y.astype(o_ref.dtype)


def edge_conv(nbr, ctr, w_top, w_ctr, scale, shift, act, out_dtype):
    # nbr: (k, R, Cn) bf16, ctr: (R, Cc) bf16, w_top: (Cn, Cout), w_ctr: (Cc, Cout)
    k, R, Cn = nbr.shape
    Cc = ctr.shape[-1]
    Cout = w_top.shape[1]
    # Fold sign(scale) into the weight columns (exact), pass |scale| to the kernel.
    sgn = jnp.where(scale >= 0.0, 1.0, -1.0).astype(jnp.float32)
    w_top = w_top * sgn[None, :]
    w_ctr = w_ctr * sgn[None, :]
    scale = jnp.abs(scale)
    Cout_p = Cout
    if Cout < 64:                       # lane-dense stores for the 3-wide final layer
        Cout_p = 128
        pad = Cout_p - Cout
        w_top = jnp.pad(w_top, ((0, 0), (0, pad)))
        w_ctr = jnp.pad(w_ctr, ((0, 0), (0, pad)))
        scale = jnp.pad(scale, (0, pad), constant_values=1.0)
        shift = jnp.pad(shift, (0, pad))
    TR = _pick_row_tile(R, k, Cn, Cc, Cout_p,
                        out_bytes=jnp.dtype(out_dtype).itemsize)
    kern = functools.partial(_edge_conv_kernel, act=act)
    out = pl.pallas_call(
        kern,
        grid=(R // TR,),
        in_specs=[pl.BlockSpec((k, TR, Cn), lambda r: (0, r, 0)),
                  pl.BlockSpec((TR, Cc), lambda r: (r, 0)),
                  pl.BlockSpec((Cn, Cout_p), lambda r: (0, 0)),
                  pl.BlockSpec((Cc, Cout_p), lambda r: (0, 0)),
                  pl.BlockSpec((1, Cout_p), lambda r: (0, 0)),
                  pl.BlockSpec((1, Cout_p), lambda r: (0, 0))],
        out_specs=pl.BlockSpec((TR, Cout_p), lambda r: (r, 0)),
        out_shape=jax.ShapeDtypeStruct((R, Cout_p), out_dtype),
        compiler_params=pltpu.CompilerParams(
            dimension_semantics=("parallel",),
            vmem_limit_bytes=_VMEM_LIMIT),
    )(nbr, ctr,
      w_top.astype(jnp.bfloat16), w_ctr.astype(jnp.bfloat16),
      scale.reshape(1, Cout_p).astype(jnp.float32),
      shift.reshape(1, Cout_p).astype(jnp.float32))
    return out[:, :Cout] if Cout_p != Cout else out


# ---------------------------------------------------------------------------
# JAX glue: k-major neighbor gather (small-index gather, no concat, no big transpose).
# ---------------------------------------------------------------------------
def gather_neighbors(xf, idx):
    # xf: (B, N, C) bf16, idx: (B, N, k) int32 -> (k, B*N, C) bf16 (k-major)
    B, N, C = xf.shape
    k = idx.shape[-1]
    idx_t = jnp.transpose(idx, (2, 0, 1))               # (k, B, N) — tiny transpose
    gather_b = jax.vmap(lambda xb, ib: xb[ib])          # per-batch row gather
    nbr = jax.vmap(lambda ik: gather_b(xf, ik))(idx_t)  # (k, B, N, C)
    return nbr.reshape(k, B * N, C)


# ---------------------------------------------------------------------------
# Parameters (deterministic). Layer i: conv weight (Cin, Cout) plus BN folded
# into per-output-channel (scale, shift). conv7 has no BN in the forward.
# ---------------------------------------------------------------------------
_LAYER_DIMS = [(6, 64), (128, 128), (256, 1024), (2176, 512),
               (1024, 256), (512, 128), (256, 3)]


def init_params(key):
    params = []
    for i, (cin, cout) in enumerate(_LAYER_DIMS):
        kw, kg, kb, km, kv = jax.random.split(jax.random.fold_in(key, i), 5)
        w = jax.random.normal(kw, (cin, cout), jnp.float32) / jnp.sqrt(float(cin))
        if i < 6:  # conv1..conv6 are followed by BatchNorm (eval mode)
            gamma = 1.0 + 0.1 * jax.random.normal(kg, (cout,), jnp.float32)
            beta = 0.1 * jax.random.normal(kb, (cout,), jnp.float32)
            mean = 0.1 * jax.random.normal(km, (cout,), jnp.float32)
            var = 0.5 + jax.random.uniform(kv, (cout,), jnp.float32)
            scale = gamma / jnp.sqrt(var + 1e-5)
            shift = beta - mean * scale
        else:      # conv7: tanh only, no BN in the forward pass
            scale = jnp.ones((cout,), jnp.float32)
            shift = jnp.zeros((cout,), jnp.float32)
        params.append((w, scale, shift))
    return params


# ---------------------------------------------------------------------------
# Full EdgeRes forward (use_SElayer=False path).
# ---------------------------------------------------------------------------
def edge_res_forward(x_bcn, params, k=K_NEIGHBORS):
    B, _, N = x_bcn.shape
    R = B * N
    x = jnp.transpose(x_bcn, (0, 2, 1)).astype(jnp.bfloat16)    # (B, N, 3)

    def std_layer(feat, i, act, out_dtype):
        C = feat.shape[-1]
        idx = knn_indices(feat, k)                              # (B, N, k)
        nbr = gather_neighbors(feat, idx)                       # (k, R, C)
        w, s, b = params[i]
        o = edge_conv(nbr, feat.reshape(R, C), w[:C], w[C:] - w[:C],
                      s, b, act, out_dtype)
        return o.reshape(B, N, -1), idx

    x1, _ = std_layer(x, 0, "relu", jnp.bfloat16)               # (B, N, 64)
    pointfeat = x1
    x2, idx2 = std_layer(x1, 1, "relu", jnp.bfloat16)           # (B, N, 128)
    x3, _ = std_layer(x2, 2, "none", jnp.bfloat16)              # (B, N, 1024) bn3 only

    g = jnp.max(x3, axis=1, keepdims=True)                      # global max over points
    g = jnp.broadcast_to(g, (B, N, x3.shape[-1]))               # (B, N, 1024)
    h = jnp.concatenate([g, pointfeat], axis=-1)                # (B, N, 1088)

    # Layer 4 (conv4) exact shortcut: g is constant per batch, so kNN(h) equals
    # kNN(pointfeat) (== idx2) and (nbr - ctr) is exactly zero on the g channels.
    w4, s4, b4 = params[3]
    c_h, c_pf = h.shape[-1], pointfeat.shape[-1]                # 1088, 64
    w_top4, w_bot4 = w4[:c_h], w4[c_h:]
    w_top_pf = w_top4[c_h - c_pf:]                              # (64, 512)
    w_ctr4 = jnp.concatenate([w_bot4[:c_h - c_pf],
                              w_bot4[c_h - c_pf:] - w_top_pf], axis=0)  # (1088, 512)
    nbr4 = gather_neighbors(pointfeat, idx2)                    # (k, R, 64) only
    x4 = edge_conv(nbr4, h.reshape(R, c_h), w_top_pf, w_ctr4,
                   s4, b4, "relu", jnp.bfloat16).reshape(B, N, -1)      # (B, N, 512)

    x5, _ = std_layer(x4, 4, "relu", jnp.bfloat16)              # (B, N, 256)
    x6, _ = std_layer(x5, 5, "relu", jnp.bfloat16)              # (B, N, 128)
    x7, _ = std_layer(x6, 6, "tanh", jnp.float32)               # (B, N, 3)

    return jnp.transpose(x7, (0, 2, 1))                         # (B, 3, N)


# ---------------------------------------------------------------------------
if __name__ == "__main__":
    key = jax.random.PRNGKey(0)
    kx, kp = jax.random.split(key)

    B, C, N = 2, 3, 16
    x = jax.random.normal(kx, (B, C, N), jnp.float32)
    params = init_params(kp)

    out = edge_res_forward(x, params)
    out = jax.block_until_ready(out)

    assert out.shape == (B, 3, N), out.shape
    assert bool(jnp.all(jnp.isfinite(out)))
    assert bool(jnp.all(jnp.abs(out) <= 1.0 + 1e-5))            # tanh output range
    print("KERNEL_OK")
</pallas_src>

<mosaic_0001>
module attributes {stable_mosaic.version = 11 : i64} {
  func.func @_knn_kernel(%arg0: i32, %arg1: i32, %arg2: memref<1x16x3xbf16, #tpu.memory_space<vmem>>, %arg3: memref<1x3x16xbf16, #tpu.memory_space<vmem>>, %arg4: memref<1x1x16xf32, #tpu.memory_space<vmem>>, %arg5: memref<1x16x8xi32, #tpu.memory_space<vmem>>) attributes {dimension_semantics = [#tpu.dimension_semantics<parallel>, #tpu.dimension_semantics<parallel>], iteration_bounds = array<i64: 2, 1>, scalar_prefetch = 0 : i64, scratch_operands = 0 : i64, tpu.core_type = #tpu.core_type<tc>, window_params = [{transform_indices = @transform_0, window_bounds = array<i64: 1, 16, 3>}, {transform_indices = @transform_1, window_bounds = array<i64: 1, 3, 16>}, {transform_indices = @transform_2, window_bounds = array<i64: 1, 1, 16>}, {transform_indices = @transform_3, window_bounds = array<i64: 1, 16, 8>}]} {
    %c0 = arith.constant 0 : index
    %c0_0 = arith.constant 0 : index
    %c0_1 = arith.constant 0 : index
    %0 = vector.load %arg2[%c0, %c0_0, %c0_1] : memref<1x16x3xbf16, #tpu.memory_space<vmem>>, vector<1x16x3xbf16>
    %1 = vector.shape_cast %0 : vector<1x16x3xbf16> to vector<16x3xbf16>
    %c0_2 = arith.constant 0 : index
    %c0_3 = arith.constant 0 : index
    %c0_4 = arith.constant 0 : index
    %2 = vector.load %arg3[%c0_2, %c0_3, %c0_4] : memref<1x3x16xbf16, #tpu.memory_space<vmem>>, vector<1x3x16xbf16>
    %3 = vector.shape_cast %2 : vector<1x3x16xbf16> to vector<3x16xbf16>
    %cst = arith.constant dense<0.000000e+00> : vector<16x16xf32>
    %4 = tpu.matmul %1, %3, %cst {dimension_numbers = #tpu.dot_dimension_numbers<[1], [0], [0], [1], [0, 0, 1, 1], [], []>} : vector<16x3xbf16>, vector<3x16xbf16>, vector<16x16xf32> -> vector<16x16xf32>
    %5 = arith.extf %1 : vector<16x3xbf16> to vector<16x3xf32>
    %6 = arith.mulf %5, %5 : vector<16x3xf32>
    %cst_5 = arith.constant dense<0.000000e+00> : vector<16xf32>
    %7 = vector.multi_reduction <add>, %6, %cst_5 [1] : vector<16x3xf32> to vector<16xf32>
    %8 = vector.shape_cast %7 : vector<16xf32> to vector<16x1xf32>
    %cst_6 = arith.constant 2.000000e+00 : f32
    %9 = vector.broadcast %cst_6 : f32 to vector<16x16xf32>
    %10 = arith.mulf %9, %4 : vector<16x16xf32>
    %11 = vector.broadcast %8 : vector<16x1xf32> to vector<16x16xf32>
    %12 = arith.subf %10, %11 : vector<16x16xf32>
    %c0_7 = arith.constant 0 : index
    %c0_8 = arith.constant 0 : index
    %c0_9 = arith.constant 0 : index
    %13 = vector.load %arg4[%c0_7, %c0_8, %c0_9] : memref<1x1x16xf32, #tpu.memory_space<vmem>>, vector<1x1x16xf32>
    %14 = vector.shape_cast %13 : vector<1x1x16xf32> to vector<1x16xf32>
    %15 = vector.broadcast %14 : vector<1x16xf32> to vector<16x16xf32>
    %16 = arith.subf %12, %15 : vector<16x16xf32>
    %17 = tpu.iota {dimensions = array<i32: 1>} : vector<16x16xi32>
    %18 = arith.sitofp %17 : vector<16x16xi32> to vector<16x16xf32>
    %19 = tpu.iota {dimensions = array<i32: 1>} : vector<16x8xi32>
    %c0_i32 = arith.constant 0 : i32
    %20 = vector.broadcast %c0_i32 : i32 to vector<16x8xi32>
    %cst_10 = arith.constant dense<0xFF800000> : vector<16xf32>
    %21 = vector.multi_reduction <maximumf>, %16, %cst_10 [1] : vector<16x16xf32> to vector<16xf32>
    %22 = vector.shape_cast %21 : vector<16xf32> to vector<16x1xf32>
    %23 = vector.broadcast %22 : vector<16x1xf32> to vector<16x16xf32>
    %24 = arith.cmpf oeq, %16, %23 : vector<16x16xf32>
    %cst_11 = arith.constant 1.600000e+01 : f32
    %25 = vector.broadcast %cst_11 : f32 to vector<16x16xf32>
    %26 = arith.select %24, %18, %25 : vector<16x16xi1>, vector<16x16xf32>
    %cst_12 = arith.constant dense<0x7F800000> : vector<16xf32>
    %27 = vector.multi_reduction <minimumf>, %26, %cst_12 [1] : vector<16x16xf32> to vector<16xf32>
    %28 = vector.shape_cast %27 : vector<16xf32> to vector<16x1xf32>
    %c0_i32_13 = arith.constant 0 : i32
    %29 = vector.broadcast %c0_i32_13 : i32 to vector<16x8xi32>
    %30 = arith.cmpi eq, %19, %29 : vector<16x8xi32>
    %31 = arith.fptosi %28 : vector<16x1xf32> to vector<16x1xi32>
    %32 = vector.shape_cast %31 : vector<16x1xi32> to vector<16x1xi32>
    %33 = vector.broadcast %32 : vector<16x1xi32> to vector<16x8xi32>
    %34 = arith.select %30, %33, %20 : vector<16x8xi1>, vector<16x8xi32>
    %35 = vector.broadcast %28 : vector<16x1xf32> to vector<16x16xf32>
    %36 = arith.cmpf oeq, %18, %35 : vector<16x16xf32>
    %cst_14 = arith.constant 0xFF800000 : f32
    %37 = vector.broadcast %cst_14 : f32 to vector<16x16xf32>
    %38 = arith.select %36, %37, %16 : vector<16x16xi1>, vector<16x16xf32>
    %cst_15 = arith.constant dense<0xFF800000> : vector<16xf32>
    %39 = vector.multi_reduction <maximumf>, %38, %cst_15 [1] : vector<16x16xf32> to vector<16xf32>
    %40 = vector.shape_cast %39 : vector<16xf32> to vector<16x1xf32>
    %41 = vector.broadcast %40 : vector<16x1xf32> to vector<16x16xf32>
    %42 = arith.cmpf oeq, %38, %41 : vector<16x16xf32>
    %cst_16 = arith.constant 1.600000e+01 : f32
    %43 = vector.broadcast %cst_16 : f32 to vector<16x16xf32>
    %44 = arith.select %42, %18, %43 : vector<16x16xi1>, vector<16x16xf32>
    %cst_17 = arith.constant dense<0x7F800000> : vector<16xf32>
    %45 = vector.multi_reduction <minimumf>, %44, %cst_17 [1] : vector<16x16xf32> to vector<16xf32>
    %46 = vector.shape_cast %45 : vector<16xf32> to vector<16x1xf32>
    %c1_i32 = arith.constant 1 : i32
    %47 = vector.broadcast %c1_i32 : i32 to vector<16x8xi32>
    %48 = arith.cmpi eq, %19, %47 : vector<16x8xi32>
    %49 = arith.fptosi %46 : vector<16x1xf32> to vector<16x1xi32>
    %50 = vector.shape_cast %49 : vector<16x1xi32> to vector<16x1xi32>
    %51 = vector.broadcast %50 : vector<16x1xi32> to vector<16x8xi32>
    %52 = arith.select %48, %51, %34 : vector<16x8xi1>, vector<16x8xi32>
    %53 = vector.broadcast %46 : vector<16x1xf32> to vector<16x16xf32>
    %54 = arith.cmpf oeq, %18, %53 : vector<16x16xf32>
    %cst_18 = arith.constant 0xFF800000 : f32
    %55 = vector.broadcast %cst_18 : f32 to vector<16x16xf32>
    %56 = arith.select %54, %55, %38 : vector<16x16xi1>, vector<16x16xf32>
    %cst_19 = arith.constant dense<0xFF800000> : vector<16xf32>
    %57 = vector.multi_reduction <maximumf>, %56, %cst_19 [1] : vector<16x16xf32> to vector<16xf32>
    %58 = vector.shape_cast %57 : vector<16xf32> to vector<16x1xf32>
    %59 = vector.broadcast %58 : vector<16x1xf32> to vector<16x16xf32>
    %60 = arith.cmpf oeq, %56, %59 : vector<16x16xf32>
    %cst_20 = arith.constant 1.600000e+01 : f32
    %61 = vector.broadcast %cst_20 : f32 to vector<16x16xf32>
    %62 = arith.select %60, %18, %61 : vector<16x16xi1>, vector<16x16xf32>
    %cst_21 = arith.constant dense<0x7F800000> : vector<16xf32>
    %63 = vector.multi_reduction <minimumf>, %62, %cst_21 [1] : vector<16x16xf32> to vector<16xf32>
    %64 = vector.shape_cast %63 : vector<16xf32> to vector<16x1xf32>
    %c2_i32 = arith.constant 2 : i32
    %65 = vector.broadcast %c2_i32 : i32 to vector<16x8xi32>
    %66 = arith.cmpi eq, %19, %65 : vector<16x8xi32>
    %67 = arith.fptosi %64 : vector<16x1xf32> to vector<16x1xi32>
    %68 = vector.shape_cast %67 : vector<16x1xi32> to vector<16x1xi32>
    %69 = vector.broadcast %68 : vector<16x1xi32> to vector<16x8xi32>
    %70 = arith.select %66, %69, %52 : vector<16x8xi1>, vector<16x8xi32>
    %71 = vector.broadcast %64 : vector<16x1xf32> to vector<16x16xf32>
    %72 = arith.cmpf oeq, %18, %71 : vector<16x16xf32>
    %cst_22 = arith.constant 0xFF800000 : f32
    %73 = vector.broadcast %cst_22 : f32 to vector<16x16xf32>
    %74 = arith.select %72, %73, %56 : vector<16x16xi1>, vector<16x16xf32>
    %cst_23 = arith.constant dense<0xFF800000> : vector<16xf32>
    %75 = vector.multi_reduction <maximumf>, %74, %cst_23 [1] : vector<16x16xf32> to vector<16xf32>
    %76 = vector.shape_cast %75 : vector<16xf32> to vector<16x1xf32>
    %77 = vector.broadcast %76 : vector<16x1xf32> to vector<16x16xf32>
    %78 = arith.cmpf oeq, %74, %77 : vector<16x16xf32>
    %cst_24 = arith.constant 1.600000e+01 : f32
    %79 = vector.broadcast %cst_24 : f32 to vector<16x16xf32>
    %80 = arith.select %78, %18, %79 : vector<16x16xi1>, vector<16x16xf32>
    %cst_25 = arith.constant dense<0x7F800000> : vector<16xf32>
    %81 = vector.multi_reduction <minimumf>, %80, %cst_25 [1] : vector<16x16xf32> to vector<16xf32>
    %82 = vector.shape_cast %81 : vector<16xf32> to vector<16x1xf32>
    %c3_i32 = arith.constant 3 : i32
    %83 = vector.broadcast %c3_i32 : i32 to vector<16x8xi32>
    %84 = arith.cmpi eq, %19, %83 : vector<16x8xi32>
    %85 = arith.fptosi %82 : vector<16x1xf32> to vector<16x1xi32>
    %86 = vector.shape_cast %85 : vector<16x1xi32> to vector<16x1xi32>
    %87 = vector.broadcast %86 : vector<16x1xi32> to vector<16x8xi32>
    %88 = arith.select %84, %87, %70 : vector<16x8xi1>, vector<16x8xi32>
    %89 = vector.broadcast %82 : vector<16x1xf32> to vector<16x16xf32>
    %90 = arith.cmpf oeq, %18, %89 : vector<16x16xf32>
    %cst_26 = arith.constant 0xFF800000 : f32
    %91 = vector.broadcast %cst_26 : f32 to vector<16x16xf32>
    %92 = arith.select %90, %91, %74 : vector<16x16xi1>, vector<16x16xf32>
    %cst_27 = arith.constant dense<0xFF800000> : vector<16xf32>
    %93 = vector.multi_reduction <maximumf>, %92, %cst_27 [1] : vector<16x16xf32> to vector<16xf32>
    %94 = vector.shape_cast %93 : vector<16xf32> to vector<16x1xf32>
    %95 = vector.broadcast %94 : vector<16x1xf32> to vector<16x16xf32>
    %96 = arith.cmpf oeq, %92, %95 : vector<16x16xf32>
    %cst_28 = arith.constant 1.600000e+01 : f32
    %97 = vector.broadcast %cst_28 : f32 to vector<16x16xf32>
    %98 = arith.select %96, %18, %97 : vector<16x16xi1>, vector<16x16xf32>
    %cst_29 = arith.constant dense<0x7F800000> : vector<16xf32>
    %99 = vector.multi_reduction <minimumf>, %98, %cst_29 [1] : vector<16x16xf32> to vector<16xf32>
    %100 = vector.shape_cast %99 : vector<16xf32> to vector<16x1xf32>
    %c4_i32 = arith.constant 4 : i32
    %101 = vector.broadcast %c4_i32 : i32 to vector<16x8xi32>
    %102 = arith.cmpi eq, %19, %101 : vector<16x8xi32>
    %103 = arith.fptosi %100 : vector<16x1xf32> to vector<16x1xi32>
    %104 = vector.shape_cast %103 : vector<16x1xi32> to vector<16x1xi32>
    %105 = vector.broadcast %104 : vector<16x1xi32> to vector<16x8xi32>
    %106 = arith.select %102, %105, %88 : vector<16x8xi1>, vector<16x8xi32>
    %107 = vector.broadcast %100 : vector<16x1xf32> to vector<16x16xf32>
    %108 = arith.cmpf oeq, %18, %107 : vector<16x16xf32>
    %cst_30 = arith.constant 0xFF800000 : f32
    %109 = vector.broadcast %cst_30 : f32 to vector<16x16xf32>
    %110 = arith.select %108, %109, %92 : vector<16x16xi1>, vector<16x16xf32>
    %cst_31 = arith.constant dense<0xFF800000> : vector<16xf32>
    %111 = vector.multi_reduction <maximumf>, %110, %cst_31 [1] : vector<16x16xf32> to vector<16xf32>
    %112 = vector.shape_cast %111 : vector<16xf32> to vector<16x1xf32>
    %113 = vector.broadcast %112 : vector<16x1xf32> to vector<16x16xf32>
    %114 = arith.cmpf oeq, %110, %113 : vector<16x16xf32>
    %cst_32 = arith.constant 1.600000e+01 : f32
    %115 = vector.broadcast %cst_32 : f32 to vector<16x16xf32>
    %116 = arith.select %114, %18, %115 : vector<16x16xi1>, vector<16x16xf32>
    %cst_33 = arith.constant dense<0x7F800000> : vector<16xf32>
    %117 = vector.multi_reduction <minimumf>, %116, %cst_33 [1] : vector<16x16xf32> to vector<16xf32>
    %118 = vector.shape_cast %117 : vector<16xf32> to vector<16x1xf32>
    %c5_i32 = arith.constant 5 : i32
    %119 = vector.broadcast %c5_i32 : i32 to vector<16x8xi32>
    %120 = arith.cmpi eq, %19, %119 : vector<16x8xi32>
    %121 = arith.fptosi %118 : vector<16x1xf32> to vector<16x1xi32>
    %122 = vector.shape_cast %121 : vector<16x1xi32> to vector<16x1xi32>
    %123 = vector.broadcast %122 : vector<16x1xi32> to vector<16x8xi32>
    %124 = arith.select %120, %123, %106 : vector<16x8xi1>, vector<16x8xi32>
    %125 = vector.broadcast %118 : vector<16x1xf32> to vector<16x16xf32>
    %126 = arith.cmpf oeq, %18, %125 : vector<16x16xf32>
    %cst_34 = arith.constant 0xFF800000 : f32
    %127 = vector.broadcast %cst_34 : f32 to vector<16x16xf32>
    %128 = arith.select %126, %127, %110 : vector<16x16xi1>, vector<16x16xf32>
    %cst_35 = arith.constant dense<0xFF800000> : vector<16xf32>
    %129 = vector.multi_reduction <maximumf>, %128, %cst_35 [1] : vector<16x16xf32> to vector<16xf32>
    %130 = vector.shape_cast %129 : vector<16xf32> to vector<16x1xf32>
    %131 = vector.broadcast %130 : vector<16x1xf32> to vector<16x16xf32>
    %132 = arith.cmpf oeq, %128, %131 : vector<16x16xf32>
    %cst_36 = arith.constant 1.600000e+01 : f32
    %133 = vector.broadcast %cst_36 : f32 to vector<16x16xf32>
    %134 = arith.select %132, %18, %133 : vector<16x16xi1>, vector<16x16xf32>
    %cst_37 = arith.constant dense<0x7F800000> : vector<16xf32>
    %135 = vector.multi_reduction <minimumf>, %134, %cst_37 [1] : vector<16x16xf32> to vector<16xf32>
    %136 = vector.shape_cast %135 : vector<16xf32> to vector<16x1xf32>
    %c6_i32 = arith.constant 6 : i32
    %137 = vector.broadcast %c6_i32 : i32 to vector<16x8xi32>
    %138 = arith.cmpi eq, %19, %137 : vector<16x8xi32>
    %139 = arith.fptosi %136 : vector<16x1xf32> to vector<16x1xi32>
    %140 = vector.shape_cast %139 : vector<16x1xi32> to vector<16x1xi32>
    %141 = vector.broadcast %140 : vector<16x1xi32> to vector<16x8xi32>
    %142 = arith.select %138, %141, %124 : vector<16x8xi1>, vector<16x8xi32>
    %143 = vector.broadcast %136 : vector<16x1xf32> to vector<16x16xf32>
    %144 = arith.cmpf oeq, %18, %143 : vector<16x16xf32>
    %cst_38 = arith.constant 0xFF800000 : f32
    %145 = vector.broadcast %cst_38 : f32 to vector<16x16xf32>
    %146 = arith.select %144, %145, %128 : vector<16x16xi1>, vector<16x16xf32>
    %cst_39 = arith.constant dense<0xFF800000> : vector<16xf32>
    %147 = vector.multi_reduction <maximumf>, %146, %cst_39 [1] : vector<16x16xf32> to vector<16xf32>
    %148 = vector.shape_cast %147 : vector<16xf32> to vector<16x1xf32>
    %149 = vector.broadcast %148 : vector<16x1xf32> to vector<16x16xf32>
    %150 = arith.cmpf oeq, %146, %149 : vector<16x16xf32>
    %cst_40 = arith.constant 1.600000e+01 : f32
    %151 = vector.broadcast %cst_40 : f32 to vector<16x16xf32>
    %152 = arith.select %150, %18, %151 : vector<16x16xi1>, vector<16x16xf32>
    %cst_41 = arith.constant dense<0x7F800000> : vector<16xf32>
    %153 = vector.multi_reduction <minimumf>, %152, %cst_41 [1] : vector<16x16xf32> to vector<16xf32>
    %154 = vector.shape_cast %153 : vector<16xf32> to vector<16x1xf32>
    %c7_i32 = arith.constant 7 : i32
    %155 = vector.broadcast %c7_i32 : i32 to vector<16x8xi32>
    %156 = arith.cmpi eq, %19, %155 : vector<16x8xi32>
    %157 = arith.fptosi %154 : vector<16x1xf32> to vector<16x1xi32>
    %158 = vector.shape_cast %157 : vector<16x1xi32> to vector<16x1xi32>
    %159 = vector.broadcast %158 : vector<16x1xi32> to vector<16x8xi32>
    %160 = arith.select %156, %159, %142 : vector<16x8xi1>, vector<16x8xi32>
    %c0_42 = arith.constant 0 : index
    %c0_43 = arith.constant 0 : index
    %c0_44 = arith.constant 0 : index
    %161 = vector.load %arg5[%c0_42, %c0_43, %c0_44] : memref<1x16x8xi32, #tpu.memory_space<vmem>>, vector<1x16x8xi32>
    %162 = vector.shape_cast %161 : vector<1x16x8xi32> to vector<16x8xi32>
    %163 = vector.shape_cast %160 : vector<16x8xi32> to vector<1x16x8xi32>
    tpu.vector_store %arg5[%c0_42, %c0_43, %c0_44], %163 {strides = array<i32>} : memref<1x16x8xi32, #tpu.memory_space<vmem>>, vector<1x16x8xi32>,
    return
  }
  func.func @transform_0(%arg0: i32, %arg1: i32) -> (i32, i32, i32) {
    %c0_i32 = arith.constant 0 : i32
    %c0_i32_0 = arith.constant 0 : i32
    return %arg0, %arg1, %c0_i32 : i32, i32, i32
  }
  func.func @transform_1(%arg0: i32, %arg1: i32) -> (i32, i32, i32) {
    %c0_i32 = arith.constant 0 : i32
    %c0_i32_0 = arith.constant 0 : i32
    %c0_i32_1 = arith.constant 0 : i32
    return %arg0, %c0_i32, %c0_i32_0 : i32, i32, i32
  }
  func.func @transform_2(%arg0: i32, %arg1: i32) -> (i32, i32, i32) {
    %c0_i32 = arith.constant 0 : i32
    %c0_i32_0 = arith.constant 0 : i32
    %c0_i32_1 = arith.constant 0 : i32
    return %arg0, %c0_i32, %c0_i32_0 : i32, i32, i32
  }
  func.func @transform_3(%arg0: i32, %arg1: i32) -> (i32, i32, i32) {
    %c0_i32 = arith.constant 0 : i32
    %c0_i32_0 = arith.constant 0 : i32
    return %arg0, %arg1, %c0_i32 : i32, i32, i32
  }
}

</mosaic_0001>

<bundles_post_ra>
// kernel: tpu_custom_call.1
= control target key start
LH: loop header
LB: loop body
LE: loop exit
PB: predicated region body
PF: predicated region fallthrough
CT: control target
= control target key end

     0   :  { %s769_s12 = smov 0   ;;  %s771_s13 = smov 0   ;;  %s969_s0 = inlined_call_operand.vmem [shape: bf16[2,16,3], index: 0, kind: input, shape index: {}]   ;;  %s970_s1 = inlined_call_operand.vmem [shape: bf16[2,3,16], index: 1, kind: input, shape index: {}]   ;;  %s971_s2 = inlined_call_operand.vmem [shape: f32[2,1,16], index: 2, kind: input, shape index: {}]   ;;  %s972_s3 = inlined_call_operand.vmem [shape: s32[2,16,8], index: 3, kind: output, shape index: {}]  }
   0x1   :  { %s773_s14 = smov 0  }
   0x2 LB: > { %s25_s15 = sadd.s32 1, %s740_s13  ;;  %p640_p0 = scmp.ge.s32.totalorder %s744_s14, 1  ;;  %s744_s14 = sphi %s773_s14, %s13_s14   ;;  %s740_s13 = sphi %s771_s13, %s974_s13   ;;  %s736_s12 = sphi %s769_s12, %s973_s12  }
   0x3   : > { %p27_p1 = scmp.ge.s32.totalorder %s25_s15, 2  ;;  %p175_p2 = scmp.lt.s32.totalorder %s744_s14, 3 }
   0x5   : > { %s976_s15 = smov (%p27_p1, %s25_s15), 0  ;;  %p176_p3 = pnand %p640_p0, %p175_p2 }
   0x6   : > { %p215_p4 = scmp.lt.s32.totalorder (!%p176_p3), %s736_s12, 1  ;;  %vm254_vm0 = vcmask (!%p176_p3), 1040384   ;;  %v746_v0 = vmov (!%p176_p3), 0.0   ;;  %vm255_vm1 = vcmask (!%p176_p3), 1041408   ;;  %v747_v1 = vmov (!%p176_p3), 65535  }
   0x7   : > { %179 = sbr.rel (%p176_p3) target bundleno = 2569 (0xa09), region = 32  ;;  %655 = vmatprep.subr.bf16.mxu0 (!%p176_p3), %v746_v0  ;;  %v256_v2 = vsel (!%p176_p3), %vm254_vm0, 4294967295, %v747_v1  ;;  %vm748_vm2 = vmmov (!%p176_p3), 0   ;;  %vm250_vm3 = vcmask (!%p176_p3), 23552   ;;  %vm328_vm4 = vcmask (!%p176_p3), 130048  }
   0x8   : > { %657 = vmatprep.mubr.msk.bf16.mxu0 (!%p176_p3), %vm748_vm2, %v746_v0  ;;  %v257_v3 = vsel (!%p176_p3), %vm255_vm1, %v256_v2, 0  ;;  %v325_v28 = vlaneseq (!%p176_p3) }
   0xa   : > { %v803_v29 = vand.u32 (!%p176_p3), 127, %v325_v28 }
   0xc   : > { %v806_v30 = vcvt.s32.f32 (!%p176_p3), %v803_v29 }
   0xe   : > { %s978_s12 = smov (!%p215_p4, %s736_s12), 1 }
   0xf   : > { %s643_s16 = sshll.u32 %s978_s12, 1  ;;  %s651_s17 = sshll.u32 %s978_s12, 3 }
  0x10   : > { %s227_s20 = scalar_lea.vmem %s970_s1, %s643_s16  ;;  %s222_s23 = scalar_lea.vmem %s969_s0, %s651_s17 }
  0x11   : > { %v244_v4 = vld [vmem:[%s227_s20] sm:$0x3]  ;;  %s230_s26 = scalar_lea.vmem %s971_s2, %s978_s12  ;;  %s652_s27 = sshll.u32 %s978_s12, 4 }
  0x12   : > { %v242_v5 = vld [vmem:[%s222_s23] sm:$0xff]   ;;  %v259_v6 = vand.u32 %v257_v3, %v244_v4  ;;  %s239_s30 = scalar_lea.vmem %s972_s3, %s652_s27 }
  0x13   : > { %v302_v7 = vunpack.c.l.bf16 %v242_v5  ;;  %v303_v8 = vunpack.c.h.bf16 %v242_v5  ;;  %v648_v18 = vld [vmem:[%s230_s26] ss:$0 sm:$0xff] }
  0x14   : > { %656 = vmatpush3.bf16.msra.mxu0 %v259_v6 }
  0x15   : > { %v304_v9 = vmul.f32 %v302_v7, %v302_v7  ;;  %v305_v10 = vmul.f32 %v303_v8, %v303_v8 }
  0x17   : > { %v306_v11 = vsel %vm250_vm3, %v304_v9, 0.0  ;;  %658 = vmatmul.mubr.msk.bf16.vlgmr.msra.gmra.mrb[0].mxu0 %vm250_vm3, %v242_v5  ;;  %v309_v12 = vsel %vm250_vm3, %v305_v10, 0.0 }
  0x18   : > { %307 = vadd.xlane.f32.xlu0 %v306_v11 }
  0x1c   : > { %310 = vadd.xlane.f32.xlu0 %v309_v12 }
  0xa5   : > { %v308_v13 = vpop.xlane.xlu0 %307 }
  0xa9   : > { %v311_v19 = vpop.xlane.xlu0 %310 }
  0xea   : > { %v295_v14 = vpop.f32.mrb[0].mxu0 }
  0xeb   : > { %v312_v15 = vmul.f32 2.0, %v295_v14  ;;  %v659_v16 = vpop.f32.mrb[1].mxu0 }
  0xec   : > { %v298_v17 = vpop.f32.mrb[2].mxu0 }
  0xed   : > { %v314_v20 = vsub.f32 %v312_v15, %v308_v13  ;;  %v313_v21 = vmul.f32 2.0, %v298_v17  ;;  %v660_v22 = vpop.f32.mrb[3].mxu0 }
  0xef   : > { %v315_v23 = vsub.f32 %v313_v21, %v311_v19  ;;  %v323_v24 = vsub.f32 %v314_v20, %v648_v18 }
  0xf1   : > { %v324_v25 = vsub.f32 %v315_v23, %v648_v18  ;;  %v329_v26 = vsel %vm328_vm4, %v323_v24, -inf }
  0xf2   : > { %330 = vmax.xlane.f32.xlu1 %v329_v26 }
  0xf3   : > { %v332_v27 = vsel %vm328_vm4, %v324_v25, -inf }
  0xf6   : > { %333 = vmax.xlane.f32.xlu1 %v332_v27 }
 0x17f   : > { %v331_v31 = vpop.xlane.xlu1 %330 }
 0x180   : > { %vm335_vm5 = vcmp.eq.f32.partialorder %v323_v24, %v331_v31 }
 0x181   : > { %v337_v32 = vsel %vm335_vm5, %v806_v30, 16.0 }
 0x182   : > { %v339_v33 = vsel %vm328_vm4, %v337_v32, inf }
 0x183   : > { %340 = vmin.xlane.f32.xlu0 %v339_v33  ;;  %v334_v34 = vpop.xlane.xlu1 %333 }
 0x184   : > { %vm336_vm6 = vcmp.eq.f32.partialorder %v324_v25, %v334_v34 }
 0x185   : > { %v338_v35 = vsel %vm336_vm6, %v806_v30, 16.0 }
 0x186   : > { %v342_v36 = vsel %vm328_vm4, %v338_v35, inf }
 0x187   : > { %343 = vmin.xlane.f32.xlu1 %v342_v36 }
 0x210   : > { %v812_v37 = vpop.xlane.xlu0 %340 }
 0x211   : > { %vm350_vm7 = vcmp.eq.f32.partialorder %v806_v30, %v812_v37 }
 0x212   : > { %v352_v38 = vsel %vm350_vm7, -inf, %v323_v24 }
 0x213   : > { %v354_v39 = vsel %vm328_vm4, %v352_v38, -inf }
 0x214   : > { %355 = vmax.xlane.f32.xlu0 %v354_v39  ;;  %v817_v40 = vpop.xlane.xlu1 %343 }
 0x215   : > { %vm351_vm8 = vcmp.eq.f32.partialorder %v806_v30, %v817_v40 }
 0x216   : > { %v353_v41 = vsel %vm351_vm8, -inf, %v324_v25 }
 0x217   : > { %v357_v42 = vsel %vm328_vm4, %v353_v41, -inf }
 0x218   : > { %358 = vmax.xlane.f32.xlu1 %v357_v42 }
 0x2a1   : > { %v356_v43 = vpop.xlane.xlu0 %355 }
 0x2a2   : > { %vm360_vm9 = vcmp.eq.f32.partialorder %v352_v38, %v356_v43 }
 0x2a3   : > { %v362_v44 = vsel %vm360_vm9, %v806_v30, 16.0 }
 0x2a4   : > { %v364_v45 = vsel %vm328_vm4, %v362_v44, inf }
 0x2a5   : > { %365 = vmin.xlane.f32.xlu0 %v364_v45  ;;  %v359_v46 = vpop.xlane.xlu1 %358 }
 0x2a6   : > { %vm361_vm10 = vcmp.eq.f32.partialorder %v353_v41, %v359_v46 }
 0x2a7   : > { %v363_v47 = vsel %vm361_vm10, %v806_v30, 16.0 }
 0x2a8   : > { %v367_v48 = vsel %vm328_vm4, %v363_v47, inf }
 0x2a9   : > { %368 = vmin.xlane.f32.xlu1 %v367_v48 }
 0x332   : > { %v826_v49 = vpop.xlane.xlu0 %365 }
 0x333   : > { %vm375_vm11 = vcmp.eq.f32.partialorder %v806_v30, %v826_v49 }
 0x334   : > { %v377_v50 = vsel %vm375_vm11, -inf, %v352_v38 }
 0x335   : > { %v379_v51 = vsel %vm328_vm4, %v377_v50, -inf }
 0x336   : > { %380 = vmax.xlane.f32.xlu0 %v379_v51  ;;  %v831_v52 = vpop.xlane.xlu1 %368 }
 0x337   : > { %vm376_vm12 = vcmp.eq.f32.partialorder %v806_v30, %v831_v52 }
 0x338   : > { %v378_v53 = vsel %vm376_vm12, -inf, %v353_v41 }
 0x339   : > { %v382_v54 = vsel %vm328_vm4, %v378_v53, -inf }
 0x33a   : > { %383 = vmax.xlane.f32.xlu1 %v382_v54 }
 0x3c3   : > { %v381_v55 = vpop.xlane.xlu0 %380 }
 0x3c4   : > { %vm385_vm13 = vcmp.eq.f32.partialorder %v377_v50, %v381_v55 }
 0x3c5   : > { %v387_v56 = vsel %vm385_vm13, %v806_v30, 16.0 }
 0x3c6   : > { %v389_v57 = vsel %vm328_vm4, %v387_v56, inf }
 0x3c7   : > { %390 = vmin.xlane.f32.xlu0 %v389_v57  ;;  %v384_v58 = vpop.xlane.xlu1 %383 }
 0x3c8   : > { %vm386_vm14 = vcmp.eq.f32.partialorder %v378_v53, %v384_v58 }
 0x3c9   : > { %v388_v59 = vsel %vm386_vm14, %v806_v30, 16.0 }
 0x3ca   : > { %v392_v60 = vsel %vm328_vm4, %v388_v59, inf }
 0x3cb   : > { %393 = vmin.xlane.f32.xlu1 %v392_v60 }
 0x454   : > { %v840_v61 = vpop.xlane.xlu0 %390 }
 0x455   : > { %vm400_vm15 = vcmp.eq.f32.partialorder %v806_v30, %v840_v61 }
 0x456   : > { %v402_v62 = vsel %vm400_vm15, -inf, %v377_v50 }
 0x457   : > { %v404_v63 = vsel %vm328_vm4, %v402_v62, -inf }
 0x458   : > { %405 = vmax.xlane.f32.xlu0 %v404_v63  ;;  %v845_v0 = vpop.xlane.xlu1 %393 }
 0x459   : > { %vm401_vm0 = vcmp.eq.f32.partialorder %v806_v30, %v845_v0 }
 0x45a   : > { %v403_v1 = vsel %vm401_vm0, -inf, %v378_v53 }
 0x45b   : > { %v407_v2 = vsel %vm328_vm4, %v403_v1, -inf }
 0x45c   : > { %408 = vmax.xlane.f32.xlu1 %v407_v2  ;;  %v663_v2 = vtrunc.f32 %v817_v40 }
 0x4e5   : > { %v406_v3 = vpop.xlane.xlu0 %405 }
 0x4e6   : > { %vm410_vm1 = vcmp.eq.f32.partialorder %v402_v62, %v406_v3  ;;  %v665_v3 = vtrunc.f32 %v826_v49  ;;  %v671_v49 = vtrunc.f32 %v845_v0 }
 0x4e7   : > { %v412_v4 = vsel %vm410_vm1, %v806_v30, 16.0 }
 0x4e8   : > { %v414_v5 = vsel %vm328_vm4, %v412_v4, inf  ;;  %v669_v4 = vtrunc.f32 %v840_v61 }
 0x4e9   : > { %415 = vmin.xlane.f32.xlu0 %v414_v5  ;;  %v409_v6 = vpop.xlane.xlu1 %408 }
 0x4ea   : > { %vm411_vm2 = vcmp.eq.f32.partialorder %v403_v1, %v409_v6  ;;  %v664_v6 = vcvt.f32.s32 %v663_v2 }
 0x4eb   : > { %v413_v7 = vsel %vm411_vm2, %v806_v30, 16.0 }
 0x4ec   : > { %v417_v8 = vsel %vm328_vm4, %v413_v7, inf  ;;  %v666_v7 = vcvt.f32.s32 %v665_v3 }
 0x4ed   : > { %418 = vmin.xlane.f32.xlu1 %v417_v8 }
 0x576   : > { %v854_v9 = vpop.xlane.xlu0 %415 }
 0x577   : > { %vm425_vm3 = vcmp.eq.f32.partialorder %v806_v30, %v854_v9  ;;  %v673_v8 = vtrunc.f32 %v854_v9 }
 0x578   : > { %v427_v10 = vsel %vm425_vm3, -inf, %v402_v62 }
 0x579   : > { %v429_v11 = vsel %vm328_vm4, %v427_v10, -inf }
 0x57a   : > { %430 = vmax.xlane.f32.xlu0 %v429_v11  ;;  %v859_v12 = vpop.xlane.xlu1 %418 }
 0x57b   : > { %vm426_vm5 = vcmp.eq.f32.partialorder %v806_v30, %v859_v12 }
 0x57c   : > { %v428_v13 = vsel %vm426_vm5, -inf, %v403_v1  ;;  %v661_v1 = vtrunc.f32 %v812_v37  ;;  %vm345_vm5 = vcmp.eq.s32.totalorder %v803_v29, 0  ;;  %v670_v37 = vcvt.f32.s32 %v669_v4 }
 0x57d   : > { %v432_v14 = vsel %vm328_vm4, %v428_v13, -inf }
 0x57e   : > { %433 = vmax.xlane.f32.xlu1 %v432_v14  ;;  %v662_v5 = vcvt.f32.s32 %v661_v1  ;;  %v674_v14 = vcvt.f32.s32 %v673_v8 }
 0x580   : > { %v348_v11 = vsel %vm345_vm5, %v662_v5, 0 }
 0x607   : > { %v431_v15 = vpop.xlane.xlu0 %430 }
 0x608   : > { %vm435_vm6 = vcmp.eq.f32.partialorder %v427_v10, %v431_v15  ;;  %v675_v15 = vtrunc.f32 %v859_v12 }
 0x609   : > { %v437_v16 = vsel %vm435_vm6, %v806_v30, 16.0  ;;  %vm370_vm6 = vcmp.eq.s32.totalorder %v803_v29, 1 }
 0x60a   : > { %v439_v17 = vsel %vm328_vm4, %v437_v16, inf  ;;  %v373_v9 = vsel %vm370_vm6, %v666_v7, %v348_v11 }
 0x60b   : > { %440 = vmin.xlane.f32.xlu0 %v439_v17  ;;  %v434_v18 = vpop.xlane.xlu1 %433 }
 0x60c   : > { %vm436_vm7 = vcmp.eq.f32.partialorder %v428_v13, %v434_v18 }
 0x60d   : > { %v438_v19 = vsel %vm436_vm7, %v806_v30, 16.0  ;;  %vm420_vm7 = vcmp.eq.s32.totalorder %v803_v29, 3 }
 0x60e   : > { %v442_v20 = vsel %vm328_vm4, %v438_v19, inf }
 0x60f   : > { %443 = vmin.xlane.f32.xlu1 %v442_v20  ;;  %v672_v20 = vcvt.f32.s32 %v671_v49 }
 0x698   : > { %v868_v21 = vpop.xlane.xlu0 %440 }
 0x699   : > { %vm450_vm8 = vcmp.eq.f32.partialorder %v806_v30, %v868_v21 }
 0x69a   : > { %v452_v22 = vsel %vm450_vm8, -inf, %v427_v10  ;;  %v677_v10 = vtrunc.f32 %v868_v21  ;;  %vm445_vm8 = vcmp.eq.s32.totalorder %v803_v29, 4 }
 0x69b   : > { %v454_v23 = vsel %vm328_vm4, %v452_v22, -inf }
 0x69c   : > { %455 = vmax.xlane.f32.xlu0 %v454_v23  ;;  %v873_v24 = vpop.xlane.xlu1 %443  ;;  %v678_v16 = vcvt.f32.s32 %v677_v10 }
 0x69d   : > { %vm451_vm9 = vcmp.eq.f32.partialorder %v806_v30, %v873_v24  ;;  %v679_v17 = vtrunc.f32 %v873_v24  ;;  %v676_v24 = vcvt.f32.s32 %v675_v15 }
 0x69e   : > { %v453_v25 = vsel %vm451_vm9, -inf, %v428_v13  ;;  %v349_v13 = vsel %vm345_vm5, %v664_v6, 0  ;;  %vm470_vm9 = vcmp.eq.s32.totalorder %v803_v29, 5 }
 0x69f   : > { %v457_v26 = vsel %vm328_vm4, %v453_v25, -inf }
 0x6a0   : > { %458 = vmax.xlane.f32.xlu1 %v457_v26 }
 0x729   : > { %v456_v27 = vpop.xlane.xlu0 %455 }
 0x72a   : > { %vm460_vm10 = vcmp.eq.f32.partialorder %v452_v22, %v456_v27 }
 0x72b   : > { %v462_v28 = vsel %vm460_vm10, %v806_v30, 16.0  ;;  %vm495_vm10 = vcmp.eq.s32.totalorder %v803_v29, 6 }
 0x72c   : > { %v464_v31 = vsel %vm328_vm4, %v462_v28, inf  ;;  %v680_v28 = vcvt.f32.s32 %v679_v17 }
 0x72d   : > { %465 = vmin.xlane.f32.xlu0 %v464_v31  ;;  %v459_v32 = vpop.xlane.xlu1 %458 }
 0x72e   : > { %vm461_vm11 = vcmp.eq.f32.partialorder %v453_v25, %v459_v32 }
 0x72f   : > { %v463_v33 = vsel %vm461_vm11, %v806_v30, 16.0  ;;  %vm520_vm11 = vcmp.eq.s32.totalorder %v803_v29, 7 }
 0x730   : > { %v467_v34 = vsel %vm328_vm4, %v463_v33, inf }
 0x731   : > { %468 = vmin.xlane.f32.xlu1 %v467_v34 }
 0x7ba   : > { %v882_v35 = vpop.xlane.xlu0 %465 }
 0x7bb   : > { %vm475_vm12 = vcmp.eq.f32.partialorder %v806_v30, %v882_v35  ;;  %v681_v40 = vtrunc.f32 %v882_v35 }
 0x7bc   : > { %v477_v36 = vsel %vm475_vm12, -inf, %v452_v22  ;;  %vm525_vm12 = vcmask 64512  }
 0x7bd   : > { %v479_v38 = vsel %vm328_vm4, %v477_v36, -inf  ;;  %v682_v0 = vcvt.f32.s32 %v681_v40 }
 0x7be   : > { %480 = vmax.xlane.f32.xlu0 %v479_v38  ;;  %v887_v39 = vpop.xlane.xlu1 %468 }
 0x7bf   : > { %vm476_vm13 = vcmp.eq.f32.partialorder %v806_v30, %v887_v39  ;;  %v683_v19 = vtrunc.f32 %v887_v39 }
 0x7c0   : > { %v478_v41 = vsel %vm476_vm13, -inf, %v453_v25 }
 0x7c1   : > { %v482_v42 = vsel %vm328_vm4, %v478_v41, -inf  ;;  %v684_v32 = vcvt.f32.s32 %v683_v19 }
 0x7c2   : > { %483 = vmax.xlane.f32.xlu1 %v482_v42 }
 0x84b   : > { %v481_v43 = vpop.xlane.xlu0 %480 }
 0x84c   : > { %vm485_vm14 = vcmp.eq.f32.partialorder %v477_v36, %v481_v43 }
 0x84d   : > { %v487_v44 = vsel %vm485_vm14, %v806_v30, 16.0 }
 0x84e   : > { %v489_v45 = vsel %vm328_vm4, %v487_v44, inf }
 0x84f   : > { %490 = vmin.xlane.f32.xlu0 %v489_v45  ;;  %v484_v46 = vpop.xlane.xlu1 %483 }
 0x850   : > { %vm486_vm15 = vcmp.eq.f32.partialorder %v478_v41, %v484_v46 }
 0x851   : > { %v488_v47 = vsel %vm486_vm15, %v806_v30, 16.0 }
 0x852   : > { %v492_v48 = vsel %vm328_vm4, %v488_v47, inf }
 0x853   : > { %493 = vmin.xlane.f32.xlu1 %v492_v48 }
 0x8dc   : > { %v491_v50 = vpop.xlane.xlu0 %490 }
 0x8dd   : > { %vm500_vm0 = vcmp.eq.f32.partialorder %v806_v30, %v491_v50  ;;  %v685_v61 = vtrunc.f32 %v491_v50 }
 0x8de   : > { %v502_v51 = vsel %vm500_vm0, -inf, %v477_v36 }
 0x8df   : > { %v504_v53 = vsel %vm328_vm4, %v502_v51, -inf  ;;  %v686_v21 = vcvt.f32.s32 %v685_v61 }
 0x8e0   : > { %505 = vmax.xlane.f32.xlu0 %v504_v53  ;;  %v898_v54 = vpop.xlane.xlu1 %493 }
 0x8e1   : > { %vm501_vm1 = vcmp.eq.f32.partialorder %v806_v30, %v898_v54  ;;  %v687_v12 = vtrunc.f32 %v898_v54 }
 0x8e2   : > { %v503_v55 = vsel %vm501_vm1, -inf, %v478_v41 }
 0x8e3   : > { %v507_v56 = vsel %vm328_vm4, %v503_v55, -inf  ;;  %v688_v36 = vcvt.f32.s32 %v687_v12 }
 0x8e4   : > { %508 = vmax.xlane.f32.xlu1 %v507_v56 }
 0x96d   : > { %v506_v57 = vpop.xlane.xlu0 %505 }
 0x96e   : > { %vm510_vm2 = vcmp.eq.f32.partialorder %v502_v51, %v506_v57 }
 0x96f   : > { %v512_v58 = vsel %vm510_vm2, %v806_v30, 16.0 }
 0x970   : > { %v514_v59 = vsel %vm328_vm4, %v512_v58, inf }
 0x971   : > { %515 = vmin.xlane.f32.xlu0 %v514_v59  ;;  %v509_v60 = vpop.xlane.xlu1 %508 }
 0x972   : > { %vm511_vm3 = vcmp.eq.f32.partialorder %v503_v55, %v509_v60 }
 0x973   : > { %v513_v62 = vsel %vm511_vm3, %v806_v30, 16.0  ;;  %v667_v30 = vtrunc.f32 %v831_v52 }
 0x974   : > { %v517_v63 = vsel %vm328_vm4, %v513_v62, inf  ;;  %vm395_vm4 = vcmp.eq.s32.totalorder %v803_v29, 2 }
 0x975   : > { %518 = vmin.xlane.f32.xlu1 %v517_v63  ;;  %v668_v52 = vcvt.f32.s32 %v667_v30  ;;  %v398_v18 = vsel %vm395_vm4, %v670_v37, %v373_v9 }
 0x976   : > { %v423_v23 = vsel %vm420_vm7, %v674_v14, %v398_v18 }
 0x977   : > { %v374_v26 = vsel %vm370_vm6, %v668_v52, %v349_v13  ;;  %v448_v27 = vsel %vm445_vm8, %v678_v16, %v423_v23 }
 0x978   : > { %v473_v31 = vsel %vm470_vm9, %v682_v0, %v448_v27  ;;  %v399_v34 = vsel %vm395_vm4, %v672_v20, %v374_v26 }
 0x979   : > { %v498_v35 = vsel %vm495_vm10, %v686_v21, %v473_v31  ;;  %v424_v39 = vsel %vm420_vm7, %v676_v24, %v399_v34 }
 0x97a   : > { %v449_v43 = vsel %vm445_vm8, %v680_v28, %v424_v39 }
 0x97b   : > { %v474_v44 = vsel %vm470_vm9, %v684_v32, %v449_v43 }
 0x97c   : > { %v499_v46 = vsel %vm495_vm10, %v688_v36, %v474_v44 }
 0x9fe   : > { %v516_v22 = vpop.xlane.xlu0 %515 }
 0x9ff   : > { %v689_v25 = vtrunc.f32 %v516_v22 }
 0xa01   : > { %v690_v33 = vcvt.f32.s32 %v689_v25 }
 0xa02   : > { %v519_v38 = vpop.xlane.xlu1 %518 }
 0xa03   : > { %v523_v41 = vsel %vm520_vm11, %v690_v33, %v498_v35  ;;  %v691_v42 = vtrunc.f32 %v519_v38 }
 0xa04   : > { %526 = vst.msk [vmem:[%s239_s30] sm:$0xff] %vm525_vm12, %v523_v41 }
 0xa05   : > { %v692_v45 = vcvt.f32.s32 %v691_v42 }
 0xa07   : > { %v524_v47 = vsel %vm520_vm11, %v692_v45, %v499_v46 }
 0xa08   : > { %527 = vst.msk [vmem:[%s239_s30 + $0x8] sm:$0xff] %vm525_vm12, %v524_v47 }
 0xa09 PF: > { %s13_s14 = sadd.s32 1, %s744_s14   ;;  %s973_s12 = smov %s740_s13 }
 0xa0a   : > { %p10_p5 = scmp.ge.s32.totalorder %s13_s14, 4   ;;  %s974_s13 = smov %s976_s15 }
 0xa0c   :  { %12 = sbr.rel (!%p10_p5) target bundleno = 2 (0x2), region = 68 }

</bundles_post_ra>
